<compile_context>
chip_gen: v6e
topology: v6e:2x2x1
jax: 0.10.0
libtpu: 0.0.40
codegen_flags: <defaults>
</compile_context>

<pallas_src>
import jax
import jax.numpy as jnp
from jax.experimental import pallas as pl
from jax.experimental.pallas import tpu as pltpu

H = 10  # hidden width of the MLP (fixed by the module spec)


def _mlp_kernel(x_ref, w1_ref, wr_ref, b_ref, o_ref):
    """Fused 4-layer MLP + final sigmoid, feature-major ([features, batch])."""
    x = x_ref[...]           # [d_in, bm]  (already f32, no cast)
    w1 = w1_ref[...]         # [10, d_in]
    wr = wr_ref[...]         # [21, 10]  = concat(W2, W3, W4) along rows
    b = b_ref[...]           # [31, 1]   = concat(b1, b2, b3, b4)[:, None]

    h = jax.nn.sigmoid(jnp.dot(w1, x, preferred_element_type=jnp.float32) + b[0:10])
    h = jax.nn.sigmoid(jnp.dot(wr[0:10], h, preferred_element_type=jnp.float32) + b[10:20])
    h = jax.nn.sigmoid(jnp.dot(wr[10:20], h, preferred_element_type=jnp.float32) + b[20:30])
    h = jax.nn.sigmoid(jnp.dot(wr[20:21], h, preferred_element_type=jnp.float32) + b[30:31])

    o_ref[...] = h.astype(o_ref.dtype)   # [1, bm] lane-dense store


def _round_up(n, m):
    return ((n + m - 1) // m) * m


def net_forward(x, params, *, bm=2048):
    """x: [B, d_in] f32 -> [B, 1] f32 (matches torch Net.forward)."""
    B, d_in = x.shape
    (w1, b1), (w2, b2), (w3, b3), (w4, b4) = params

    # Pack the 8 tiny parameter tensors into 3 arrays -> only 4 pipelined inputs.
    w1 = w1.astype(jnp.float32)                                            # [10, d_in]
    w_rest = jnp.concatenate([w2, w3, w4], axis=0).astype(jnp.float32)     # [21, 10]
    b_all = jnp.concatenate([b1, b2, b3, b4]).astype(jnp.float32)[:, None] # [31, 1]

    # Batch tile: multiple of 128 (lane width), big enough to amortise the
    # per-grid-step overhead, small enough to trivially fit VMEM on any chip.
    bm = max(128, min(_round_up(bm, 128), _round_up(B, 128)))
    Bp = _round_up(B, bm)

    # Feature-major layout: batch rides the 128-lane axis.
    xt = x.astype(jnp.float32)
    if Bp != B:
        xt = jnp.pad(xt, ((0, Bp - B), (0, 0)))
    xt = xt.T                                                              # [d_in, Bp]

    out_t = pl.pallas_call(
        _mlp_kernel,
        out_shape=jax.ShapeDtypeStruct((1, Bp), jnp.float32),
        grid=(Bp // bm,),                                 # tile over the batch
        in_specs=[
            pl.BlockSpec((d_in, bm), lambda i: (0, i)),   # x tile (only moving input)
            pl.BlockSpec(w1.shape, lambda i: (0, 0)),     # resident weights
            pl.BlockSpec(w_rest.shape, lambda i: (0, 0)),
            pl.BlockSpec(b_all.shape, lambda i: (0, 0)),
        ],
        out_specs=pl.BlockSpec((1, bm), lambda i: (0, i)),  # lane-dense output
        compiler_params=pltpu.CompilerParams(
            dimension_semantics=("parallel",)),
    )(xt, w1, w_rest, b_all)

    return out_t[0, :B][:, None]                          # back to [B, 1]


def init_params(key, d_in):
    """PyTorch nn.Linear-style init: U(-1/sqrt(fan_in), 1/sqrt(fan_in)).

    Weights stored PyTorch-style as [out, in]; biases as [out]."""
    dims = [(d_in, H), (H, H), (H, H), (H, 1)]
    params = []
    for i, (fan_in, fan_out) in enumerate(dims):
        kw, kb = jax.random.split(jax.random.fold_in(key, i))
        bound = 1.0 / jnp.sqrt(float(fan_in))
        w = jax.random.uniform(kw, (fan_out, fan_in), jnp.float32, -bound, bound)
        b = jax.random.uniform(kb, (fan_out,), jnp.float32, -bound, bound)
        params.append((w, b))
    return params


def net_forward_ref(x, params):
    """Pure-JAX reference for correctness checking."""
    (w1, b1), (w2, b2), (w3, b3), (w4, b4) = params
    h = jax.nn.sigmoid(x @ w1.T + b1)
    h = jax.nn.sigmoid(h @ w2.T + b2)
    h = jax.nn.sigmoid(h @ w3.T + b3)
    return jax.nn.sigmoid(h @ w4.T + b4)


if __name__ == "__main__":
    key = jax.random.PRNGKey(0)
    d_in = 32
    batch = 16

    k_x, k_p = jax.random.split(key)
    x = jax.random.normal(k_x, (batch, d_in), jnp.float32)
    params = init_params(k_p, d_in)

    out = jax.block_until_ready(net_forward(x, params))
    ref = net_forward_ref(x, params)

    assert out.shape == (batch, 1), out.shape
    assert jnp.allclose(out, ref, atol=1e-5, rtol=1e-5), "mismatch vs reference"

    print("KERNEL_OK")
</pallas_src>

<mosaic_0001>
module attributes {stable_mosaic.version = 11 : i64} {
  func.func @_mlp_kernel(%arg0: i32, %arg1: memref<32x128xf32, #tpu.memory_space<vmem>>, %arg2: memref<10x32xf32, #tpu.memory_space<vmem>>, %arg3: memref<21x10xf32, #tpu.memory_space<vmem>>, %arg4: memref<31x1xf32, #tpu.memory_space<vmem>>, %arg5: memref<1x128xf32, #tpu.memory_space<vmem>>) attributes {dimension_semantics = [#tpu.dimension_semantics<parallel>], iteration_bounds = array<i64: 1>, scalar_prefetch = 0 : i64, scratch_operands = 0 : i64, tpu.core_type = #tpu.core_type<tc>, window_params = [{transform_indices = @transform_0, window_bounds = array<i64: 32, 128>}, {pipeline_mode = #tpu.pipeline_mode<synchronous>, transform_indices = @transform_1, window_bounds = array<i64: 10, 32>}, {pipeline_mode = #tpu.pipeline_mode<synchronous>, transform_indices = @transform_2, window_bounds = array<i64: 21, 10>}, {pipeline_mode = #tpu.pipeline_mode<synchronous>, transform_indices = @transform_3, window_bounds = array<i64: 31, 1>}, {transform_indices = @transform_4, window_bounds = array<i64: 1, 128>}]} {
    %c0 = arith.constant 0 : index
    %c0_0 = arith.constant 0 : index
    %0 = vector.load %arg1[%c0, %c0_0] : memref<32x128xf32, #tpu.memory_space<vmem>>, vector<32x128xf32>
    %c0_1 = arith.constant 0 : index
    %c0_2 = arith.constant 0 : index
    %1 = vector.load %arg2[%c0_1, %c0_2] : memref<10x32xf32, #tpu.memory_space<vmem>>, vector<10x32xf32>
    %c0_3 = arith.constant 0 : index
    %c0_4 = arith.constant 0 : index
    %2 = vector.load %arg3[%c0_3, %c0_4] : memref<21x10xf32, #tpu.memory_space<vmem>>, vector<21x10xf32>
    %c0_5 = arith.constant 0 : index
    %c0_6 = arith.constant 0 : index
    %3 = vector.load %arg4[%c0_5, %c0_6] : memref<31x1xf32, #tpu.memory_space<vmem>>, vector<31x1xf32>
    %cst = arith.constant dense<0.000000e+00> : vector<10x128xf32>
    %4 = tpu.matmul %1, %0, %cst {dimension_numbers = #tpu.dot_dimension_numbers<[1], [0], [0], [1], [0, 0, 1, 1], [], []>} : vector<10x32xf32>, vector<32x128xf32>, vector<10x128xf32> -> vector<10x128xf32>
    %5 = vector.extract_strided_slice %3 {offsets = [0, 0], sizes = [10, 1], strides = [1, 1]} : vector<31x1xf32> to vector<10x1xf32>
    %6 = vector.broadcast %5 : vector<10x1xf32> to vector<10x128xf32>
    %7 = arith.addf %4, %6 : vector<10x128xf32>
    %8 = arith.negf %7 : vector<10x128xf32>
    %9 = math.exp %8 : vector<10x128xf32>
    %cst_7 = arith.constant 1.000000e+00 : f32
    %10 = vector.broadcast %cst_7 : f32 to vector<10x128xf32>
    %11 = arith.addf %10, %9 : vector<10x128xf32>
    %12 = arith.divf %10, %11 : vector<10x128xf32>
    %13 = vector.extract_strided_slice %2 {offsets = [0, 0], sizes = [10, 10], strides = [1, 1]} : vector<21x10xf32> to vector<10x10xf32>
    %cst_8 = arith.constant dense<0.000000e+00> : vector<10x128xf32>
    %14 = tpu.matmul %13, %12, %cst_8 {dimension_numbers = #tpu.dot_dimension_numbers<[1], [0], [0], [1], [0, 0, 1, 1], [], []>} : vector<10x10xf32>, vector<10x128xf32>, vector<10x128xf32> -> vector<10x128xf32>
    %15 = vector.extract_strided_slice %3 {offsets = [10, 0], sizes = [10, 1], strides = [1, 1]} : vector<31x1xf32> to vector<10x1xf32>
    %16 = vector.broadcast %15 : vector<10x1xf32> to vector<10x128xf32>
    %17 = arith.addf %14, %16 : vector<10x128xf32>
    %18 = arith.negf %17 : vector<10x128xf32>
    %19 = math.exp %18 : vector<10x128xf32>
    %cst_9 = arith.constant 1.000000e+00 : f32
    %20 = vector.broadcast %cst_9 : f32 to vector<10x128xf32>
    %21 = arith.addf %20, %19 : vector<10x128xf32>
    %22 = arith.divf %20, %21 : vector<10x128xf32>
    %23 = vector.extract_strided_slice %2 {offsets = [10, 0], sizes = [10, 10], strides = [1, 1]} : vector<21x10xf32> to vector<10x10xf32>
    %cst_10 = arith.constant dense<0.000000e+00> : vector<10x128xf32>
    %24 = tpu.matmul %23, %22, %cst_10 {dimension_numbers = #tpu.dot_dimension_numbers<[1], [0], [0], [1], [0, 0, 1, 1], [], []>} : vector<10x10xf32>, vector<10x128xf32>, vector<10x128xf32> -> vector<10x128xf32>
    %25 = vector.extract_strided_slice %3 {offsets = [20, 0], sizes = [10, 1], strides = [1, 1]} : vector<31x1xf32> to vector<10x1xf32>
    %26 = vector.broadcast %25 : vector<10x1xf32> to vector<10x128xf32>
    %27 = arith.addf %24, %26 : vector<10x128xf32>
    %28 = arith.negf %27 : vector<10x128xf32>
    %29 = math.exp %28 : vector<10x128xf32>
    %cst_11 = arith.constant 1.000000e+00 : f32
    %30 = vector.broadcast %cst_11 : f32 to vector<10x128xf32>
    %31 = arith.addf %30, %29 : vector<10x128xf32>
    %32 = arith.divf %30, %31 : vector<10x128xf32>
    %33 = vector.extract_strided_slice %2 {offsets = [20, 0], sizes = [1, 10], strides = [1, 1]} : vector<21x10xf32> to vector<1x10xf32>
    %cst_12 = arith.constant dense<0.000000e+00> : vector<1x128xf32>
    %34 = tpu.matmul %33, %32, %cst_12 {dimension_numbers = #tpu.dot_dimension_numbers<[1], [0], [0], [1], [0, 0, 1, 1], [], []>} : vector<1x10xf32>, vector<10x128xf32>, vector<1x128xf32> -> vector<1x128xf32>
    %35 = vector.extract_strided_slice %3 {offsets = [30, 0], sizes = [1, 1], strides = [1, 1]} : vector<31x1xf32> to vector<1x1xf32>
    %36 = vector.broadcast %35 : vector<1x1xf32> to vector<1x128xf32>
    %37 = arith.addf %34, %36 : vector<1x128xf32>
    %38 = arith.negf %37 : vector<1x128xf32>
    %39 = math.exp %38 : vector<1x128xf32>
    %cst_13 = arith.constant 1.000000e+00 : f32
    %40 = vector.broadcast %cst_13 : f32 to vector<1x128xf32>
    %41 = arith.addf %40, %39 : vector<1x128xf32>
    %42 = arith.divf %40, %41 : vector<1x128xf32>
    %c0_14 = arith.constant 0 : index
    %c0_15 = arith.constant 0 : index
    %43 = vector.load %arg5[%c0_14, %c0_15] : memref<1x128xf32, #tpu.memory_space<vmem>>, vector<1x128xf32>
    tpu.vector_store %arg5[%c0_14, %c0_15], %42 {strides = array<i32>} : memref<1x128xf32, #tpu.memory_space<vmem>>, vector<1x128xf32>,
    return
  }
  func.func @transform_0(%arg0: i32) -> (i32, i32) {
    %c0_i32 = arith.constant 0 : i32
    %c0_i32_0 = arith.constant 0 : i32
    return %c0_i32, %arg0 : i32, i32
  }
  func.func @transform_1(%arg0: i32) -> (i32, i32) {
    %c0_i32 = arith.constant 0 : i32
    %c0_i32_0 = arith.constant 0 : i32
    %c0_i32_1 = arith.constant 0 : i32
    return %c0_i32, %c0_i32_0 : i32, i32
  }
  func.func @transform_2(%arg0: i32) -> (i32, i32) {
    %c0_i32 = arith.constant 0 : i32
    %c0_i32_0 = arith.constant 0 : i32
    %c0_i32_1 = arith.constant 0 : i32
    return %c0_i32, %c0_i32_0 : i32, i32
  }
  func.func @transform_3(%arg0: i32) -> (i32, i32) {
    %c0_i32 = arith.constant 0 : i32
    %c0_i32_0 = arith.constant 0 : i32
    %c0_i32_1 = arith.constant 0 : i32
    return %c0_i32, %c0_i32_0 : i32, i32
  }
  func.func @transform_4(%arg0: i32) -> (i32, i32) {
    %c0_i32 = arith.constant 0 : i32
    %c0_i32_0 = arith.constant 0 : i32
    return %c0_i32, %arg0 : i32, i32
  }
}

</mosaic_0001>

<bundles_post_ra>
// kernel: tpu_custom_call.1
= control target key start
LH: loop header
LB: loop body
LE: loop exit
PB: predicated region body
PF: predicated region fallthrough
CT: control target
= control target key end

     0   :  { %vm41_vm0 = vcmask 261120   ;;  %v572_v3 = vmov 0   ;;  %s655_s0 = inlined_call_operand.vmem [shape: f32[32,128], index: 0, kind: input, shape index: {}]   ;;  %s656_s1 = inlined_call_operand.vmem [shape: f32[10,32], index: 1, kind: input, shape index: {}]   ;;  %s657_s2 = inlined_call_operand.vmem [shape: f32[21,10], index: 2, kind: input, shape index: {}]   ;;  %s658_s3 = inlined_call_operand.vmem [shape: f32[31,1], index: 3, kind: input, shape index: {}]   ;;  %s659_s4 = inlined_call_operand.hbm [shape: f32[1,128], index: 4, kind: output, shape index: {}]  }
   0x1   :  { %v21_v0 = vld [vmem:[%s655_s0 + $0x18] sm:$0xff]  ;;  %v20_v1 = vld [vmem:[%s655_s0 + $0x10] sm:$0xff]  ;;  %v22_v2 = vld [vmem:[%s656_s1] sm:$0xff]  ;;  %520 = vset.pattern.permute.xlu0 %v572_v3 }
   0x2   :  { %484 = vmatprep.subr.mxu0 %v21_v0  ;;  %v19_v4 = vld [vmem:[%s655_s0 + $0x8] sm:$0xff]  ;;  %492 = vmatprep.mubr.msk.f32.mxu0 %vm41_vm0, %v22_v2  ;;  %v29_v6 = vld [vmem:[%s658_s3 + $0x10] sm:$0xff] }
   0x3   :  { %485 = vmatpush3.msra.mxu0 %v21_v0  ;;  %v28_v5 = vld [vmem:[%s658_s3 + $0x8] sm:$0xff] }
   0x4   :  { %486 = vmatprep.subr.mxu0 %v20_v1  ;;  %38 = vperm.xlu0 %520, %v28_v5  }
   0x5   :  { %9 = vsyncpa [#allocation3], 0  ;;  %487 = vmatpush3.msra.mxu0 %v20_v1  ;;  %v18_v7 = vld [vmem:[%s655_s0] sm:$0xff]  ;;  %521 = vset.pattern.permute.xlu1 %v572_v3  ;;  %v23_v9 = vld [vmem:[%s656_s1 + $0x8] sm:$0x3]  ;;  %vm145_vm1 = vcmask 80896  }
   0x6   :  { %v27_v8 = vld [vmem:[%s658_s3] sm:$0xff]  ;;  %488 = vmatprep.subr.mxu0 %v19_v4  ;;  %137 = vperm.xlu1 %521, %v29_v6   ;;  %v30_v11 = vld [vmem:[%s658_s3 + $0x18] sm:$0x7f]  ;;  %vm152_vm2 = vcmask 1041408   ;;  %v25_v26 = vld [vmem:[%s657_s2 + $0x8] sm:$0xff]  ;;  %vm139_vm3 = vcmask 1045504  }
   0x7   :  { %489 = vmatpush3.msra.mxu0 %v19_v4  ;;  %v24_v10 = vld [vmem:[%s657_s2] sm:$0xff]  ;;  %v248_v27 = vrot.slane %v25_v26, 2  ;;  %v26_v28 = vld [vmem:[%s657_s2 + $0x10] sm:$0x1f]  ;;  %v573_v47 = vmov 0.0   ;;  %vm574_vm4 = vmmov 0  }
   0x8   :  { %490 = vmatprep.subr.mxu0 %v18_v7  ;;  %33 = vperm.xlu0 %520, %v27_v8   ;;  %v249_v29 = vrot.slane %v26_v28, 2  ;;  %vm251_vm5 = vcmask 1043456   ;;  %v351_v63 = vrot.slane %v26_v28, 4  ;;  %s575_s2 = smov [#allocation2]  }
   0x9   :  { %491 = vmatpush3.msra.mxu0 %v18_v7  ;;  %499 = vmatprep.mubr.msk.f32.mxu1 %vm145_vm1, %v24_v10  ;;  %s442_s12 = sshll.u32 %s575_s2, 4  ;;  %s443_s12 = int_to_ptr.vmem [resolvable:$true] %s442_s12 }
   0xa   :  { %493 = vmatmul.mubr.msk.f32.vlgmr.msra.gmra.mxu0 %vm41_vm0, %v23_v9  ;;  %245 = vperm.xlu1 %521, %v30_v11   ;;  %v250_v30 = vsel %vm139_vm3, %v248_v27, %v249_v29  ;;  %s550_s13 = scalar_lea.vmem %s443_s12, 16  ;;  %s554_s14 = scalar_lea.vmem %s443_s12, 32 }
   0xb   :  { %509 = vmatprep.subr.mxu0 %v573_v47  ;;  %513 = vmatprep.mubr.msk.f32.mxu0 %vm574_vm4, %v573_v47  ;;  %p551_p0 = scmp.ne.s32.totalorder %s443_s12, %s550_s13  ;;  %p555_p1 = scmp.lt.s32.totalorder %s443_s12, %s443_s12 }
   0xc   :  { %p556_p2 = scmp.lt.s32.totalorder %s554_s14, %s550_s13 }
   0xe   :  { %p557_p3 = por %p556_p2, %p555_p1 }
  0x10   :  { %p558_p4 = pnand %p557_p3, %p551_p0 }
  0x7f   :  { %v39_v12 = vpop.permute.xlu0 %38 }
  0x80   :  { %v140_v32 = vrot.slane %v39_v12, 2 }
  0x81   :  { %v138_v31 = vpop.permute.xlu1 %137 }
  0x82   :  { %v141_v33 = vrot.slane %v138_v31, 2  ;;  %v252_v49 = vrot.slane %v138_v31, 4 }
  0x83   :  { %v34_v15 = vpop.permute.xlu0 %33 }
  0x84   :  { %v142_v36 = vsel %vm139_vm3, %v140_v32, %v141_v33 }
  0x85   :  { %v246_v48 = vpop.permute.xlu1 %245 }
  0x86   :  { %v253_v50 = vrot.slane %v246_v48, 4  ;;  %v352_v1 = vrot.slane %v246_v48, 6 }
  0x88   :  { %v254_v53 = vsel %vm251_vm5, %v252_v49, %v253_v50 }
  0xca   :  { %v494_v13 = vpop.f32.mrf.mxu0 }
  0xcb   :  { %v120_v14 = vadd.f32 %v494_v13, %v39_v12 }
  0xcc   :  { %v114_v16 = vpop.f32.mrf.mxu0 }
  0xcd   :  { %v453_v17 = vmul.f32 -1.442695, %v120_v14  ;;  %v115_v18 = vadd.f32 %v114_v16, %v34_v15 }
  0xcf   :  { %522 = vpow2.f32 %v453_v17  ;;  %v452_v19 = vmul.f32 -1.442695, %v115_v18 }
  0xd1   :  { %524 = vpow2.f32 %v452_v19 }
  0xdc   :  { %v523_v20 = vpop.eup %522 }
  0xdd   :  { %v130_v21 = vadd.f32 1.0, %v523_v20 }
  0xde   :  { %v525_v22 = vpop.eup %524 }
  0xdf   :  { %526 = vrcp.f32 %v130_v21  ;;  %v129_v23 = vadd.f32 1.0, %v525_v22 }
  0xe1   :  { %528 = vrcp.f32 %v129_v23 }
  0xec   :  { %v527_v24 = vpop.eup %526 }
  0xed   :  { %495 = vmatprep.subr.msk.mxu1 %vm152_vm2, %v527_v24 }
  0xee   :  { %v529_v25 = vpop.eup %528  ;;  %496 = vmatpush3.msk.msra.mxu1 %vm152_vm2, %v527_v24 }
  0xef   :  { %497 = vmatprep.subr.mxu1 %v529_v25 }
  0xf0   :  { %498 = vmatpush3.msra.mxu1 %v529_v25 }
  0xf1   :  { %500 = vmatmul.mubr.msk.f32.vlgmr.msra.gmra.mxu1 %vm145_vm1, %v25_v26 }
  0xf2   :  { %506 = vmatprep.mubr.msk.f32.mxu1 %vm145_vm1, %v250_v30 }
 0x1b1   :  { %v501_v34 = vpop.f32.mrf.mxu1 }
 0x1b2   :  { %v228_v35 = vadd.f32 %v501_v34, %v141_v33 }
 0x1b3   :  { %v222_v37 = vpop.f32.mrf.mxu1 }
 0x1b4   :  { %v458_v38 = vmul.f32 -1.442695, %v228_v35  ;;  %v223_v39 = vadd.f32 %v222_v37, %v142_v36 }
 0x1b6   :  { %530 = vpow2.f32 %v458_v38  ;;  %v457_v40 = vmul.f32 -1.442695, %v223_v39 }
 0x1b8   :  { %532 = vpow2.f32 %v457_v40 }
 0x1c3   :  { %v531_v41 = vpop.eup %530 }
 0x1c4   :  { %v238_v42 = vadd.f32 1.0, %v531_v41 }
 0x1c5   :  { %v533_v43 = vpop.eup %532 }
 0x1c6   :  { %534 = vrcp.f32 %v238_v42  ;;  %v237_v44 = vadd.f32 1.0, %v533_v43 }
 0x1c8   :  { %536 = vrcp.f32 %v237_v44 }
 0x1d3   :  { %v535_v45 = vpop.eup %534 }
 0x1d4   :  { %502 = vmatprep.subr.msk.mxu1 %vm152_vm2, %v535_v45 }
 0x1d5   :  { %v537_v46 = vpop.eup %536  ;;  %503 = vmatpush3.msk.msra.mxu1 %vm152_vm2, %v535_v45 }
 0x1d6   :  { %504 = vmatprep.subr.mxu1 %v537_v46 }
 0x1d7   :  { %505 = vmatpush3.msra.mxu1 %v537_v46 }
 0x1d8   :  { %507 = vmatmul.mubr.msk.f32.vlgmr.msra.gmra.mxu1 %vm145_vm1, %v249_v29 }
 0x298   :  { %v508_v51 = vpop.f32.mrf.mxu1 }
 0x299   :  { %v336_v52 = vadd.f32 %v508_v51, %v253_v50 }
 0x29a   :  { %v330_v54 = vpop.f32.mrf.mxu1 }
 0x29b   :  { %v463_v55 = vmul.f32 -1.442695, %v336_v52  ;;  %v331_v56 = vadd.f32 %v330_v54, %v254_v53 }
 0x29d   :  { %538 = vpow2.f32 %v463_v55  ;;  %v462_v57 = vmul.f32 -1.442695, %v331_v56 }
 0x29f   :  { %540 = vpow2.f32 %v462_v57 }
 0x2aa   :  { %v539_v58 = vpop.eup %538 }
 0x2ab   :  { %v346_v59 = vadd.f32 1.0, %v539_v58 }
 0x2ac   :  { %v541_v60 = vpop.eup %540 }
 0x2ad   :  { %542 = vrcp.f32 %v346_v59  ;;  %v345_v61 = vadd.f32 1.0, %v541_v60 }
 0x2af   :  { %544 = vrcp.f32 %v345_v61 }
 0x2ba   :  { %v543_v62 = vpop.eup %542 }
 0x2bb   :  { %510 = vmatpush3.msk.msra.mxu0 %vm152_vm2, %v543_v62 }
 0x2bc   :  { %v545_v0 = vpop.eup %544  ;;  %511 = vmatprep.subr.mxu0 %v573_v47 }
 0x2bd   :  { %512 = vmatpush3.msra.mxu0 %v545_v0 }
 0x2be   :  { %514 = vmatmul.mubr.msk.f32.vlgmr.msra.gmra.mxu0 %vm145_vm1, %v351_v63 }
 0x37e   :  { %v425_v2 = vpop.f32.mrf.mxu0 }
 0x37f   :  { %v426_v3 = vadd.f32 %v425_v2, %v352_v1 }
 0x380   :  { %v515_v4 = vpop.f32.mrf.mxu0 }
 0x381   :  { %v466_v5 = vmul.f32 -1.442695, %v426_v3 }
 0x383   :  { %546 = vpow2.f32 %v466_v5 }
 0x390   :  { %v547_v6 = vpop.eup %546 }
 0x391   :  { %v432_v7 = vadd.f32 1.0, %v547_v6 }
 0x393   :  { %548 = vrcp.f32 %v432_v7 }
 0x3a0   :  { %v549_v8 = vpop.eup %548 }
 0x3a1   :  { %435 = vst [vmem:[#allocation2] sm:$0x1] %v549_v8 }
 0x3a2   :  { %561 = shalt.err (!%p558_p4)
}
 0x3a3   :  { %445 = dma.vmem_to_hbm [thread:$0]  %s443_s12, 16, %s659_s4, [#allocation3]  }
 0x3a4   :  { %570 = dma.done.wait [#allocation3], 16  }
 0x3a5   :  { %571 = vsyncadd [#allocation3], 4294967280 }
 0x3a6   :  { %449 = vsyncpa [#allocation3], 1 }

</bundles_post_ra>
